<compile_context>
chip_gen: v7x
topology: tpu7x:2x2x1
jax: 0.10.0
libtpu: 0.0.40
codegen_flags: <defaults>
</compile_context>

<pallas_src>
import jax
import jax.numpy as jnp
from jax.experimental import pallas as pl
from jax.experimental.pallas import tpu as pltpu


def _abs_diff_kernel(x1_ref, x2_ref, o_ref):
    # Elementwise |x1 - x2| on the current VMEM tile (pure VPU work).
    o_ref[...] = jnp.abs(x1_ref[...] - x2_ref[...])


_LANE_WIDTH = 1024        # max lane-dense width (multiple of 128)
_TILE_BYTES = 2 << 20     # per-array per-tile VMEM budget (~2 MiB)


def _choose_lanes(n: int) -> int:
    """Widest 128-multiple lane width (<= _LANE_WIDTH); prefers one that divides n."""
    if n <= _LANE_WIDTH:
        return max(128, ((n + 127) // 128) * 128)
    for w in range(_LANE_WIDTH, 0, -128):
        if n % w == 0:
            return w
    return _LANE_WIDTH


def cost_loss(x1: jax.Array, x2: jax.Array) -> jax.Array:
    """Pallas TPU implementation of CostLoss.forward: returns |x1 - x2| elementwise."""
    assert x1.shape == x2.shape and x1.dtype == x2.dtype
    orig_shape = x1.shape

    x1f = x1.reshape(-1)
    x2f = x2.reshape(-1)
    n = x1f.shape[0]
    if n == 0:  # degenerate empty input
        return jnp.abs(x1 - x2)

    # Lane-dense slab layout (rows, lanes).
    lanes = _choose_lanes(n)
    rows = (n + lanes - 1) // lanes
    padded = rows * lanes
    if padded != n:
        x1f = jnp.pad(x1f, (0, padded - n))
        x2f = jnp.pad(x2f, (0, padded - n))
    x1_2d = x1f.reshape(rows, lanes)
    x2_2d = x2f.reshape(rows, lanes)

    # Dtype-aware row tiling: ~2 MiB per array per tile, multiple of 32 sublanes
    # (valid for f32/bf16/int8 packing).  Single block for small inputs.
    itemsize = jnp.dtype(x1.dtype).itemsize
    target_rows = max(32, (_TILE_BYTES // (lanes * itemsize)) // 32 * 32)
    tile_r = rows if rows <= target_rows else target_rows
    grid = (pl.cdiv(rows, tile_r),)

    out = pl.pallas_call(
        _abs_diff_kernel,
        out_shape=jax.ShapeDtypeStruct((rows, lanes), x1.dtype),
        grid=grid,
        in_specs=[
            pl.BlockSpec((tile_r, lanes), lambda i: (i, 0)),
            pl.BlockSpec((tile_r, lanes), lambda i: (i, 0)),
        ],
        out_specs=pl.BlockSpec((tile_r, lanes), lambda i: (i, 0)),
        compiler_params=pltpu.CompilerParams(
            dimension_semantics=("parallel",),
        ),
    )(x1_2d, x2_2d)

    out_flat = out.reshape(-1)
    if padded != n:
        out_flat = out_flat[:n]
    return out_flat.reshape(orig_shape)


if __name__ == "__main__":
    key = jax.random.PRNGKey(0)
    k1, k2, k3, k4, k5, k6 = jax.random.split(key, 6)

    # Small tabular-style shapes (Wachter counterfactual setting): batch=2, features=32.
    x1 = jax.random.normal(k1, (2, 32), dtype=jnp.float32)
    x2 = jax.random.normal(k2, (2, 32), dtype=jnp.float32)
    out = cost_loss(x1, x2)
    jax.block_until_ready(out)
    ref = jnp.abs(x1 - x2)
    assert out.shape == ref.shape and out.dtype == ref.dtype
    assert jnp.allclose(out, ref, atol=0.0, rtol=0.0)

    # Non-lane-aligned shape: exercises the padding fallback path.
    y1 = jax.random.normal(k3, (37, 300), dtype=jnp.float32)
    y2 = jax.random.normal(k4, (37, 300), dtype=jnp.float32)
    out2 = cost_loss(y1, y2)
    jax.block_until_ready(out2)
    ref2 = jnp.abs(y1 - y2)
    assert out2.shape == ref2.shape and out2.dtype == ref2.dtype
    assert jnp.allclose(out2, ref2, atol=0.0, rtol=0.0)

    # Aligned shape large enough for a multi-step grid with a ragged last block
    # (600 rows of 1024 lanes, tile = 512 rows): exercises pipelining + masking.
    z1 = jax.random.normal(k5, (600, 1024), dtype=jnp.float32)
    z2 = jax.random.normal(k6, (600, 1024), dtype=jnp.float32)
    out3 = cost_loss(z1, z2)
    jax.block_until_ready(out3)
    ref3 = jnp.abs(z1 - z2)
    assert out3.shape == ref3.shape and out3.dtype == ref3.dtype
    assert jnp.allclose(out3, ref3, atol=0.0, rtol=0.0)

    print("KERNEL_OK")
</pallas_src>

<mosaic_0001>
module attributes {stable_mosaic.version = 11 : i64} {
  func.func @_abs_diff_kernel(%arg0: i32, %arg1: memref<1x128xf32, #tpu.memory_space<vmem>>, %arg2: memref<1x128xf32, #tpu.memory_space<vmem>>, %arg3: memref<1x128xf32, #tpu.memory_space<vmem>>) attributes {dimension_semantics = [#tpu.dimension_semantics<parallel>], iteration_bounds = array<i64: 1>, scalar_prefetch = 0 : i64, scratch_operands = 0 : i64, tpu.core_type = #tpu.core_type<tc>, window_params = [{transform_indices = @transform_0, window_bounds = array<i64: 1, 128>}, {transform_indices = @transform_1, window_bounds = array<i64: 1, 128>}, {transform_indices = @transform_2, window_bounds = array<i64: 1, 128>}]} {
    %c0 = arith.constant 0 : index
    %c0_0 = arith.constant 0 : index
    %0 = vector.load %arg1[%c0, %c0_0] : memref<1x128xf32, #tpu.memory_space<vmem>>, vector<1x128xf32>
    %c0_1 = arith.constant 0 : index
    %c0_2 = arith.constant 0 : index
    %1 = vector.load %arg2[%c0_1, %c0_2] : memref<1x128xf32, #tpu.memory_space<vmem>>, vector<1x128xf32>
    %2 = arith.subf %0, %1 : vector<1x128xf32>
    %3 = math.absf %2 : vector<1x128xf32>
    %c0_3 = arith.constant 0 : index
    %c0_4 = arith.constant 0 : index
    %4 = vector.load %arg3[%c0_3, %c0_4] : memref<1x128xf32, #tpu.memory_space<vmem>>, vector<1x128xf32>
    tpu.vector_store %arg3[%c0_3, %c0_4], %3 {strides = array<i32>} : memref<1x128xf32, #tpu.memory_space<vmem>>, vector<1x128xf32>,
    return
  }
  func.func @transform_0(%arg0: i32) -> (i32, i32) {
    %c0_i32 = arith.constant 0 : i32
    %c0_i32_0 = arith.constant 0 : i32
    return %arg0, %c0_i32 : i32, i32
  }
  func.func @transform_1(%arg0: i32) -> (i32, i32) {
    %c0_i32 = arith.constant 0 : i32
    %c0_i32_0 = arith.constant 0 : i32
    return %arg0, %c0_i32 : i32, i32
  }
  func.func @transform_2(%arg0: i32) -> (i32, i32) {
    %c0_i32 = arith.constant 0 : i32
    %c0_i32_0 = arith.constant 0 : i32
    return %arg0, %c0_i32 : i32, i32
  }
}

</mosaic_0001>

<bundles_post_ra>
// kernel: tpu_custom_call.1
= control target key start
LH: loop header
LB: loop body
LE: loop exit
PB: predicated region body
PF: predicated region fallthrough
CT: control target
= control target key end

     0   :  { %7 = vsyncpa [#allocation3], 0  ;;  %s138_s0 = inlined_call_operand.hbm [shape: f32[1,128], index: 0, kind: input, shape index: {}]   ;;  %s139_s1 = inlined_call_operand.vmem [shape: f32[1,128], index: 1, kind: input, shape index: {}]   ;;  %s140_s2 = inlined_call_operand.hbm [shape: f32[1,128], index: 2, kind: output, shape index: {}]  }
   0x1   :  { %8 = vsyncpa [#allocation4], 0  ;;  %s94_s9 = smov [#allocation2]   ;;  %s46_s13 = scalar_lea.hbm %s138_s0, 16 }
   0x2   :  { %s15_s10 = sshll.u32 %s94_s9, 4  ;;  %p47_p0 = scmp.ne.s32.totalorder %s138_s0, %s46_s13  ;;  %s16_s10 = int_to_ptr.vmem [resolvable:$true] %s15_s10 }
   0x3   :  { %p50_p1 = scmp.lt.u32.totalorder %s46_s13, %s138_s0 }
   0x5   :  { %p52_p2 = pnand %p50_p1, %p47_p0 }
   0x7   :  { %55 = shalt.err (!%p52_p2)
}
   0x8   :  { %s56_s18 = scalar_lea.vmem %s16_s10, 16  ;;  %s60_s19 = scalar_lea.vmem %s16_s10, 32 }
   0x9   :  { %p57_p3 = scmp.ne.s32.totalorder %s16_s10, %s56_s18  ;;  %p61_p4 = scmp.lt.s32.totalorder %s16_s10, %s16_s10 }
   0xa   :  { %p62_p5 = scmp.lt.s32.totalorder %s60_s19, %s56_s18 }
   0xc   :  { %p63_p6 = por %p62_p5, %p61_p4 }
   0xe   :  { %p64_p7 = pnand %p63_p6, %p57_p3 }
  0x10   :  { %67 = shalt.err (!%p64_p7)
}
  0x11   :  { %18 = dma.hbm_to_vmem [thread:$0]  %s138_s0, 16, %s16_s10, [#allocation3]  }
  0x12   :  { %90 = dma.done.wait [#allocation3], 16  }
  0x13   :  { %91 = vsyncadd [#allocation3], 4294967280  ;;  %v24_v0 = vld [vmem:[#allocation2] sm:$0x1]  ;;  %s95_s24 = smov [#allocation5]  }
  0x14   :  { %v25_v1 = vld [vmem:[%s139_s1] sm:$0x1]  ;;  %s35_s25 = sshll.u32 %s95_s24, 4  ;;  %s36_s25 = int_to_ptr.vmem [resolvable:$true] %s35_s25 }
  0x15   :  { %v26_v2 = vsub.f32 %v24_v0, %v25_v1  ;;  %s68_s26 = scalar_lea.vmem %s36_s25, 16  ;;  %s72_s27 = scalar_lea.vmem %s36_s25, 32 }
  0x16   :  { %p69_p8 = scmp.ne.s32.totalorder %s36_s25, %s68_s26  ;;  %p73_p9 = scmp.lt.s32.totalorder %s36_s25, %s36_s25 }
  0x17   :  { %v27_v3 = vand.u32 2147483647, %v26_v2  ;;  %p74_p10 = scmp.lt.s32.totalorder %s72_s27, %s68_s26 }
  0x19   :  { %28 = vst [vmem:[#allocation5] sm:$0x1] %v27_v3  ;;  %p75_p11 = por %p74_p10, %p73_p9 }
  0x1b   :  { %p76_p12 = pnand %p75_p11, %p69_p8 }
  0x1d   :  { %79 = shalt.err (!%p76_p12)
}
  0x1e   :  { %s80_s29 = scalar_lea.hbm %s140_s2, 16 }
  0x1f   :  { %p81_p13 = scmp.ne.s32.totalorder %s140_s2, %s80_s29  ;;  %p84_p0 = scmp.lt.u32.totalorder %s80_s29, %s140_s2 }
  0x21   :  { %p86_p1 = pnand %p84_p0, %p81_p13 }
  0x23   :  { %89 = shalt.err (!%p86_p1)
}
  0x24   :  { %38 = dma.vmem_to_hbm [thread:$0]  %s36_s25, 16, %s140_s2, [#allocation4]  }
  0x25   :  { %92 = dma.done.wait [#allocation4], 16  }
  0x26   :  { %93 = vsyncadd [#allocation4], 4294967280 }
  0x27   :  { %42 = vsyncpa [#allocation3], 1 }
  0x28   :  { %43 = vsyncpa [#allocation4], 1 }

</bundles_post_ra>
